<compile_context>
chip_gen: v7x
topology: tpu7x:2x2x1
jax: 0.10.0
libtpu: 0.0.40
codegen_flags: <defaults>
</compile_context>

<pallas_src>
import functools

import jax
import jax.numpy as jnp
from jax.experimental import pallas as pl
from jax.experimental.pallas import tpu as pltpu

LANE = 128
SUBLANE_BF16 = 16


def mlp_kernel(x_ref, w1_ref, b1_ref, w2_ref, b2_ref, w3_ref, b3_ref, o_ref):
    # x already bf16; MXU bf16 inputs, f32 accumulate.
    x = x_ref[...]

    # Layer 1: Linear + ReLU
    h1 = jnp.dot(x, w1_ref[...], preferred_element_type=jnp.float32)
    h1 = jnp.maximum(h1 + b1_ref[...], 0.0).astype(jnp.bfloat16)

    # Layer 2: Linear + ReLU
    h2 = jnp.dot(h1, w2_ref[...], preferred_element_type=jnp.float32)
    h2 = jnp.maximum(h2 + b2_ref[...], 0.0).astype(jnp.bfloat16)

    # Output layer: Linear (no activation)
    out = jnp.dot(h2, w3_ref[...], preferred_element_type=jnp.float32) + b3_ref[...]
    o_ref[...] = out.astype(o_ref.dtype)


def _round_up(n, m):
    return ((n + m - 1) // m) * m


def _pad_to(arr, shape):
    pads = [(0, t - s) for s, t in zip(arr.shape, shape)]
    return jnp.pad(arr, pads)


def prepare_params(params):
    """One-time prep: pad weights/biases to lane-dense (128-multiple) shapes and
    cast weights to bf16.  Returns (padded_params, output_dim)."""
    w1, b1 = params["w1"], params["b1"]
    w2, b2 = params["w2"], params["b2"]
    w3, b3 = params["w3"], params["b3"]
    D_in, H1 = w1.shape
    H2 = w2.shape[1]
    D_out = w3.shape[1]
    D_in_p, H1_p, H2_p, D_out_p = (_round_up(d, LANE) for d in (D_in, H1, H2, D_out))
    prepared = {
        "w1": _pad_to(w1, (D_in_p, H1_p)).astype(jnp.bfloat16),
        "b1": _pad_to(b1, (1, H1_p)).astype(jnp.float32),
        "w2": _pad_to(w2, (H1_p, H2_p)).astype(jnp.bfloat16),
        "b2": _pad_to(b2, (1, H2_p)).astype(jnp.float32),
        "w3": _pad_to(w3, (H2_p, D_out_p)).astype(jnp.bfloat16),
        "b3": _pad_to(b3, (1, D_out_p)).astype(jnp.float32),
    }
    prepared = jax.tree_util.tree_map(jax.device_put, prepared)
    return prepared, D_out


@functools.partial(jax.jit, static_argnames=("out_dim",))
def policy_network_forward(x, prepared, out_dim):
    """x: [B, D_in] float32; prepared: output of prepare_params."""
    w1, b1 = prepared["w1"], prepared["b1"]
    w2, b2 = prepared["w2"], prepared["b2"]
    w3, b3 = prepared["w3"], prepared["b3"]

    B, D_in = x.shape
    D_in_p, H1_p = w1.shape
    H2_p = w2.shape[1]
    D_out_p = w3.shape[1]

    # --- Batch tile selection (static, derived from shapes at trace time) ---
    # Small B: one program (grid=(1,)) — no per-step pipeline overhead.
    # Large B: MXU-filling 256-row tiles, batch axis "parallel" for v7x megacore.
    if B <= 512:
        Bt = _round_up(max(B, SUBLANE_BF16), SUBLANE_BF16)
        B_p = Bt
    else:
        Bt = 256
        B_p = _round_up(B, Bt)

    # Pad x (batch + lane) and cast to bf16 — halves x DMA bytes per tile.
    x_p = _pad_to(x.astype(jnp.bfloat16), (B_p, D_in_p))

    grid = (B_p // Bt,)

    # Advisory cost estimate (padded problem sizes).
    flops = 2 * B_p * (D_in_p * H1_p + H1_p * H2_p + H2_p * D_out_p)
    bytes_accessed = (
        x_p.size * 2
        + (w1.size + w2.size + w3.size) * 2
        + (b1.size + b2.size + b3.size) * 4
        + B_p * D_out_p * 4
    )
    cost = pl.CostEstimate(flops=flops, transcendentals=0,
                           bytes_accessed=bytes_accessed)

    # Weights / biases: same block for every grid step -> VMEM-resident.
    def resident(shape):
        return pl.BlockSpec(shape, lambda i: (0, 0))

    out_p = pl.pallas_call(
        mlp_kernel,
        out_shape=jax.ShapeDtypeStruct((B_p, D_out_p), jnp.float32),
        grid=grid,
        in_specs=[
            pl.BlockSpec((Bt, D_in_p), lambda i: (i, 0)),   # x: tiled over batch
            resident((D_in_p, H1_p)), resident((1, H1_p)),
            resident((H1_p, H2_p)),   resident((1, H2_p)),
            resident((H2_p, D_out_p)), resident((1, D_out_p)),
        ],
        out_specs=pl.BlockSpec((Bt, D_out_p), lambda i: (i, 0)),
        compiler_params=pltpu.CompilerParams(
            dimension_semantics=("parallel",)),
        cost_estimate=cost,
    )(x_p, w1, b1, w2, b2, w3, b3)

    # Slice away batch / lane padding.
    return out_p[:B, :out_dim]


def init_params(key, input_dim, output_dim, hidden_dims):
    """Mimics PyTorch nn.Linear default init: U[-1/sqrt(fan_in), 1/sqrt(fan_in)].
    Weights stored transposed: [in, out]."""
    dims = [input_dim] + list(hidden_dims) + [output_dim]
    params = {}
    for i in range(len(dims) - 1):
        fan_in, fan_out = dims[i], dims[i + 1]
        key, kw, kb = jax.random.split(key, 3)
        bound = 1.0 / jnp.sqrt(float(fan_in))
        params[f"w{i+1}"] = jax.random.uniform(
            kw, (fan_in, fan_out), jnp.float32, -bound, bound)
        params[f"b{i+1}"] = jax.random.uniform(
            kb, (1, fan_out), jnp.float32, -bound, bound)
    return params


def reference_forward_f32(x, params):
    h = jnp.maximum(x @ params["w1"] + params["b1"], 0.0)
    h = jnp.maximum(h @ params["w2"] + params["b2"], 0.0)
    return h @ params["w3"] + params["b3"]


def reference_forward_bf16(x, params):
    """Matches kernel numerics: bf16 matmul operands, f32 accumulate."""
    def lin(h, w, b):
        return jnp.dot(h.astype(jnp.bfloat16), w.astype(jnp.bfloat16),
                       preferred_element_type=jnp.float32) + b
    h = jnp.maximum(lin(x, params["w1"], params["b1"]), 0.0)
    h = jnp.maximum(lin(h, params["w2"], params["b2"]), 0.0)
    return lin(h, params["w3"], params["b3"])


if __name__ == "__main__":
    key = jax.random.PRNGKey(0)
    B, input_dim, output_dim = 64, 32, 8
    hidden_dims = [64, 64]

    kx, kp = jax.random.split(key)
    x = jax.random.normal(kx, (B, input_dim), jnp.float32)
    params = init_params(kp, input_dim, output_dim, hidden_dims)

    # One-time weight prep (pad + bf16 cast) outside the forward.
    prepared, out_dim = prepare_params(params)

    out = policy_network_forward(x, prepared, out_dim)
    out = jax.block_until_ready(out)

    assert out.shape == (B, output_dim)
    # Tight check vs. precision-matched (bf16 operands, f32 accumulate) reference.
    ref_bf16 = reference_forward_bf16(x, params)
    assert jnp.allclose(out, ref_bf16, atol=1e-3, rtol=1e-3), "mismatch vs bf16 reference"
    # Loose sanity check vs. full-f32 reference (semantics of the PyTorch module).
    ref_f32 = reference_forward_f32(x, params)
    assert jnp.allclose(out, ref_f32, atol=5e-2, rtol=5e-2), "mismatch vs f32 reference"

    print("KERNEL_OK")
</pallas_src>

<mosaic_0001>
module attributes {stable_mosaic.version = 11 : i64} {
  func.func @mlp_kernel(%arg0: i32, %arg1: memref<64x128xbf16, #tpu.memory_space<vmem>>, %arg2: memref<128x128xbf16, #tpu.memory_space<vmem>>, %arg3: memref<1x128xf32, #tpu.memory_space<vmem>>, %arg4: memref<128x128xbf16, #tpu.memory_space<vmem>>, %arg5: memref<1x128xf32, #tpu.memory_space<vmem>>, %arg6: memref<128x128xbf16, #tpu.memory_space<vmem>>, %arg7: memref<1x128xf32, #tpu.memory_space<vmem>>, %arg8: memref<64x128xf32, #tpu.memory_space<vmem>>) attributes {dimension_semantics = [#tpu.dimension_semantics<parallel>], iteration_bounds = array<i64: 1>, scalar_prefetch = 0 : i64, scratch_operands = 0 : i64, tpu.core_type = #tpu.core_type<tc>, window_params = [{transform_indices = @transform_0, window_bounds = array<i64: 64, 128>}, {pipeline_mode = #tpu.pipeline_mode<synchronous>, transform_indices = @transform_1, window_bounds = array<i64: 128, 128>}, {pipeline_mode = #tpu.pipeline_mode<synchronous>, transform_indices = @transform_2, window_bounds = array<i64: 1, 128>}, {pipeline_mode = #tpu.pipeline_mode<synchronous>, transform_indices = @transform_3, window_bounds = array<i64: 128, 128>}, {pipeline_mode = #tpu.pipeline_mode<synchronous>, transform_indices = @transform_4, window_bounds = array<i64: 1, 128>}, {pipeline_mode = #tpu.pipeline_mode<synchronous>, transform_indices = @transform_5, window_bounds = array<i64: 128, 128>}, {pipeline_mode = #tpu.pipeline_mode<synchronous>, transform_indices = @transform_6, window_bounds = array<i64: 1, 128>}, {transform_indices = @transform_7, window_bounds = array<i64: 64, 128>}]} {
    %c0 = arith.constant 0 : index
    %c0_0 = arith.constant 0 : index
    %0 = vector.load %arg1[%c0, %c0_0] : memref<64x128xbf16, #tpu.memory_space<vmem>>, vector<64x128xbf16>
    %c0_1 = arith.constant 0 : index
    %c0_2 = arith.constant 0 : index
    %1 = vector.load %arg2[%c0_1, %c0_2] : memref<128x128xbf16, #tpu.memory_space<vmem>>, vector<128x128xbf16>
    %cst = arith.constant dense<0.000000e+00> : vector<64x128xf32>
    %2 = tpu.matmul %0, %1, %cst {dimension_numbers = #tpu.dot_dimension_numbers<[1], [0], [0], [1], [0, 0, 1, 1], [], []>} : vector<64x128xbf16>, vector<128x128xbf16>, vector<64x128xf32> -> vector<64x128xf32>
    %c0_3 = arith.constant 0 : index
    %c0_4 = arith.constant 0 : index
    %3 = vector.load %arg3[%c0_3, %c0_4] : memref<1x128xf32, #tpu.memory_space<vmem>>, vector<1x128xf32>
    %4 = vector.broadcast %3 : vector<1x128xf32> to vector<64x128xf32>
    %5 = arith.addf %2, %4 : vector<64x128xf32>
    %cst_5 = arith.constant 0.000000e+00 : f32
    %6 = vector.broadcast %cst_5 : f32 to vector<64x128xf32>
    %7 = arith.maximumf %5, %6 : vector<64x128xf32>
    %8 = arith.truncf %7 : vector<64x128xf32> to vector<64x128xbf16>
    %c0_6 = arith.constant 0 : index
    %c0_7 = arith.constant 0 : index
    %9 = vector.load %arg4[%c0_6, %c0_7] : memref<128x128xbf16, #tpu.memory_space<vmem>>, vector<128x128xbf16>
    %cst_8 = arith.constant dense<0.000000e+00> : vector<64x128xf32>
    %10 = tpu.matmul %8, %9, %cst_8 {dimension_numbers = #tpu.dot_dimension_numbers<[1], [0], [0], [1], [0, 0, 1, 1], [], []>} : vector<64x128xbf16>, vector<128x128xbf16>, vector<64x128xf32> -> vector<64x128xf32>
    %c0_9 = arith.constant 0 : index
    %c0_10 = arith.constant 0 : index
    %11 = vector.load %arg5[%c0_9, %c0_10] : memref<1x128xf32, #tpu.memory_space<vmem>>, vector<1x128xf32>
    %12 = vector.broadcast %11 : vector<1x128xf32> to vector<64x128xf32>
    %13 = arith.addf %10, %12 : vector<64x128xf32>
    %cst_11 = arith.constant 0.000000e+00 : f32
    %14 = vector.broadcast %cst_11 : f32 to vector<64x128xf32>
    %15 = arith.maximumf %13, %14 : vector<64x128xf32>
    %16 = arith.truncf %15 : vector<64x128xf32> to vector<64x128xbf16>
    %c0_12 = arith.constant 0 : index
    %c0_13 = arith.constant 0 : index
    %17 = vector.load %arg6[%c0_12, %c0_13] : memref<128x128xbf16, #tpu.memory_space<vmem>>, vector<128x128xbf16>
    %cst_14 = arith.constant dense<0.000000e+00> : vector<64x128xf32>
    %18 = tpu.matmul %16, %17, %cst_14 {dimension_numbers = #tpu.dot_dimension_numbers<[1], [0], [0], [1], [0, 0, 1, 1], [], []>} : vector<64x128xbf16>, vector<128x128xbf16>, vector<64x128xf32> -> vector<64x128xf32>
    %c0_15 = arith.constant 0 : index
    %c0_16 = arith.constant 0 : index
    %19 = vector.load %arg7[%c0_15, %c0_16] : memref<1x128xf32, #tpu.memory_space<vmem>>, vector<1x128xf32>
    %20 = vector.broadcast %19 : vector<1x128xf32> to vector<64x128xf32>
    %21 = arith.addf %18, %20 : vector<64x128xf32>
    %c0_17 = arith.constant 0 : index
    %c0_18 = arith.constant 0 : index
    %22 = vector.load %arg8[%c0_17, %c0_18] : memref<64x128xf32, #tpu.memory_space<vmem>>, vector<64x128xf32>
    tpu.vector_store %arg8[%c0_17, %c0_18], %21 {strides = array<i32>} : memref<64x128xf32, #tpu.memory_space<vmem>>, vector<64x128xf32>,
    return
  }
  func.func @transform_0(%arg0: i32) -> (i32, i32) {
    %c0_i32 = arith.constant 0 : i32
    %c0_i32_0 = arith.constant 0 : i32
    return %arg0, %c0_i32 : i32, i32
  }
  func.func @transform_1(%arg0: i32) -> (i32, i32) {
    %c0_i32 = arith.constant 0 : i32
    %c0_i32_0 = arith.constant 0 : i32
    %c0_i32_1 = arith.constant 0 : i32
    return %c0_i32, %c0_i32_0 : i32, i32
  }
  func.func @transform_2(%arg0: i32) -> (i32, i32) {
    %c0_i32 = arith.constant 0 : i32
    %c0_i32_0 = arith.constant 0 : i32
    %c0_i32_1 = arith.constant 0 : i32
    return %c0_i32, %c0_i32_0 : i32, i32
  }
  func.func @transform_3(%arg0: i32) -> (i32, i32) {
    %c0_i32 = arith.constant 0 : i32
    %c0_i32_0 = arith.constant 0 : i32
    %c0_i32_1 = arith.constant 0 : i32
    return %c0_i32, %c0_i32_0 : i32, i32
  }
  func.func @transform_4(%arg0: i32) -> (i32, i32) {
    %c0_i32 = arith.constant 0 : i32
    %c0_i32_0 = arith.constant 0 : i32
    %c0_i32_1 = arith.constant 0 : i32
    return %c0_i32, %c0_i32_0 : i32, i32
  }
  func.func @transform_5(%arg0: i32) -> (i32, i32) {
    %c0_i32 = arith.constant 0 : i32
    %c0_i32_0 = arith.constant 0 : i32
    %c0_i32_1 = arith.constant 0 : i32
    return %c0_i32, %c0_i32_0 : i32, i32
  }
  func.func @transform_6(%arg0: i32) -> (i32, i32) {
    %c0_i32 = arith.constant 0 : i32
    %c0_i32_0 = arith.constant 0 : i32
    %c0_i32_1 = arith.constant 0 : i32
    return %c0_i32, %c0_i32_0 : i32, i32
  }
  func.func @transform_7(%arg0: i32) -> (i32, i32) {
    %c0_i32 = arith.constant 0 : i32
    %c0_i32_0 = arith.constant 0 : i32
    return %arg0, %c0_i32 : i32, i32
  }
}

</mosaic_0001>

<bundles_post_ra>
// kernel: policy_network_forward.1
= control target key start
LH: loop header
LB: loop body
LE: loop exit
PB: predicated region body
PF: predicated region fallthrough
CT: control target
= control target key end

     0   :  { %12 = vsyncpa [#allocation3], 0  ;;  %s728_s24 = smov [#allocation2]   ;;  %s876_s0 = inlined_call_operand.vmem [shape: bf16[64,128], index: 0, kind: input, shape index: {}]   ;;  %s877_s1 = inlined_call_operand.vmem [shape: bf16[128,128], index: 1, kind: input, shape index: {}]   ;;  %s878_s2 = inlined_call_operand.vmem [shape: f32[1,128], index: 2, kind: input, shape index: {}]   ;;  %s879_s3 = inlined_call_operand.vmem [shape: bf16[128,128], index: 3, kind: input, shape index: {}]   ;;  %s880_s4 = inlined_call_operand.vmem [shape: f32[1,128], index: 4, kind: input, shape index: {}]   ;;  %s881_s5 = inlined_call_operand.hbm [shape: bf16[128,128], index: 5, kind: input, shape index: {}]   ;;  %s882_s6 = inlined_call_operand.vmem [shape: f32[1,128], index: 6, kind: input, shape index: {}]   ;;  %s883_s7 = inlined_call_operand.vmem [shape: f32[64,128], index: 7, kind: output, shape index: {}]  }
   0x1   :  { %s28_s25 = sshll.u32 %s728_s24, 4  ;;  %s704_s28 = scalar_lea.hbm %s881_s5, 1024  ;;  %s29_s25 = int_to_ptr.vmem [resolvable:$true] %s28_s25 }
   0x2   :  { %p705_p0 = scmp.ne.s32.totalorder %s881_s5, %s704_s28  ;;  %p708_p1 = scmp.lt.u32.totalorder %s704_s28, %s881_s5 }
   0x4   :  { %p710_p2 = pnand %p708_p1, %p705_p0 }
   0x6   :  { %713 = shalt.err (!%p710_p2)
}
   0x7   :  { %s714_s10 = scalar_lea.vmem %s29_s25, 1024  ;;  %p719_p4 = scmp.lt.s32.totalorder %s29_s25, %s29_s25 }
   0x8   :  { %p715_p3 = scmp.ne.s32.totalorder %s29_s25, %s714_s10  ;;  %p720_p5 = scmp.lt.s32.totalorder %s714_s10, %s714_s10 }
   0xa   :  { %p721_p6 = por %p720_p5, %p719_p4 }
   0xc   :  { %p722_p7 = pnand %p721_p6, %p715_p3 }
   0xe   :  { %725 = shalt.err (!%p722_p7)
}
   0xf   :  { %s729_s11 = smov 64   ;;  %s730_s12 = smov 4  }
  0x10   :  { %34 = dma.hbm_to_vmem [thread:$0]  %s881_s5, 1024, %s29_s25, [#allocation3], %s729_s11, %s729_s11, %s730_s12  }
  0x11   :  { %726 = dma.done.wait [#allocation3], 1024  }
  0x12   :  { %727 = vsyncadd [#allocation3], 4294966272  ;;  %v676_v0 = vld [vmem:[%s877_s1] sm:$0xff]   ;;  %v677_v1 = vld [vmem:[%s877_s1 + $0x8] sm:$0xff]  }
  0x13   :  { %585 = vmatprep.subr.bf16.mxu0 %v676_v0  ;;  %v678_v2 = vld [vmem:[%s877_s1 + $0x10] sm:$0xff]   ;;  %v679_v3 = vld [vmem:[%s877_s1 + $0x18] sm:$0xff]   ;;  %v684_v4 = vld [vmem:[%s876_s0] sm:$0xff]  }
  0x14   :  { %586 = vmatpush3.bf16.msra.mxu0 %v676_v0  ;;  %601 = vmatprep.mubr.bf16.mxu0 %v684_v4  ;;  %v680_v5 = vld [vmem:[%s877_s1 + $0x20] sm:$0xff]   ;;  %v689_v7 = vld [vmem:[%s879_s3 + $0x8] sm:$0xff]   ;;  %v690_v9 = vld [vmem:[%s879_s3 + $0x10] sm:$0xff]  }
  0x15   :  { %587 = vmatprep.subr.bf16.mxu0 %v677_v1  ;;  %v688_v6 = vld [vmem:[%s879_s3] sm:$0xff]   ;;  %v681_v8 = vld [vmem:[%s877_s1 + $0x28] sm:$0xff]   ;;  %v682_v10 = vld [vmem:[%s877_s1 + $0x30] sm:$0xff]  }
  0x16   :  { %609 = vmatprep.subr.bf16.mxu1 %v688_v6  ;;  %v691_v11 = vld [vmem:[%s879_s3 + $0x18] sm:$0xff]   ;;  %v692_v13 = vld [vmem:[%s879_s3 + $0x20] sm:$0xff]   ;;  %v693_v14 = vld [vmem:[%s879_s3 + $0x28] sm:$0xff]  }
  0x17   :  { %610 = vmatpush3.bf16.msra.mxu1 %v688_v6  ;;  %v683_v12 = vld [vmem:[%s877_s1 + $0x38] sm:$0xff]   ;;  %v685_v15 = vld [vmem:[%s876_s0 + $0x8] sm:$0xff]   ;;  %v686_v16 = vld [vmem:[%s876_s0 + $0x10] sm:$0xff]  }
  0x18   :  { %588 = vmatpush3.bf16.msra.mxu0 %v677_v1  ;;  %611 = vmatprep.subr.bf16.mxu1 %v689_v7  ;;  %v687_v17 = vld [vmem:[%s876_s0 + $0x18] sm:$0xff]   ;;  %v694_v18 = vld [vmem:[%s879_s3 + $0x30] sm:$0xff]   ;;  %v696_v20 = vld [vmem:[#allocation2] sm:$0xff]  }
  0x19   :  { %589 = vmatprep.subr.bf16.mxu0 %v678_v2  ;;  %v695_v19 = vld [vmem:[%s879_s3 + $0x38] sm:$0xff]   ;;  %v697_v21 = vld [vmem:[#allocation2 + $0x8] sm:$0xff]   ;;  %v698_v22 = vld [vmem:[#allocation2 + $0x10] sm:$0xff]  }
  0x1a   :  { %v699_v23 = vld [vmem:[#allocation2 + $0x18] sm:$0xff]   ;;  %v700_v24 = vld [vmem:[#allocation2 + $0x20] sm:$0xff]   ;;  %v701_v25 = vld [vmem:[#allocation2 + $0x28] sm:$0xff]  }
  0x1b   :  { %612 = vmatpush3.bf16.msra.mxu1 %v689_v7  ;;  %v518_v26 = vld [vmem:[%s878_s2] ss:$0 sm:$0xff]  ;;  %v702_v55 = vld [vmem:[#allocation2 + $0x30] sm:$0xff]   ;;  %v703_v56 = vld [vmem:[#allocation2 + $0x38] sm:$0xff]  }
  0x1c   :  { %590 = vmatpush3.bf16.msra.mxu0 %v678_v2  ;;  %613 = vmatprep.subr.bf16.mxu1 %v690_v9  ;;  %v531_v57 = vld [vmem:[%s880_s4] ss:$0 sm:$0xff] }
  0x1d   :  { %591 = vmatprep.subr.bf16.mxu0 %v679_v3 }
  0x1f   :  { %614 = vmatpush3.bf16.msra.mxu1 %v690_v9 }
  0x20   :  { %592 = vmatpush3.bf16.msra.mxu0 %v679_v3  ;;  %615 = vmatprep.subr.bf16.mxu1 %v691_v11 }
  0x21   :  { %593 = vmatprep.subr.bf16.mxu0 %v680_v5 }
  0x23   :  { %616 = vmatpush3.bf16.msra.mxu1 %v691_v11 }
  0x24   :  { %594 = vmatpush3.bf16.msra.mxu0 %v680_v5  ;;  %617 = vmatprep.subr.bf16.mxu1 %v692_v13 }
  0x25   :  { %595 = vmatprep.subr.bf16.mxu0 %v681_v8 }
  0x27   :  { %618 = vmatpush3.bf16.msra.mxu1 %v692_v13 }
  0x28   :  { %596 = vmatpush3.bf16.msra.mxu0 %v681_v8  ;;  %619 = vmatprep.subr.bf16.mxu1 %v693_v14 }
  0x29   :  { %597 = vmatprep.subr.bf16.mxu0 %v682_v10 }
  0x2b   :  { %620 = vmatpush3.bf16.msra.mxu1 %v693_v14 }
  0x2c   :  { %598 = vmatpush3.bf16.msra.mxu0 %v682_v10  ;;  %621 = vmatprep.subr.bf16.mxu1 %v694_v18 }
  0x2d   :  { %599 = vmatprep.subr.bf16.mxu0 %v683_v12 }
  0x2f   :  { %622 = vmatpush3.bf16.msra.mxu1 %v694_v18 }
  0x30   :  { %600 = vmatpush3.bf16.msra.mxu0 %v683_v12  ;;  %623 = vmatprep.subr.bf16.mxu1 %v695_v19 }
  0x31   :  { %633 = vmatprep.subr.bf16.mxu0 %v696_v20 }
  0x33   :  { %602 = vmatmul.mubr.bf16.vlgmr.msra.gmra.mrb[0].mxu0 %v685_v15  ;;  %624 = vmatpush3.bf16.msra.mxu1 %v695_v19 }
  0x34   :  { %605 = vmatprep.mubr.bf16.mxu0 %v686_v16  ;;  %657 = vmatprep.subr.bf16.mxu1 %v696_v20 }
  0x35   :  { %634 = vmatpush3.bf16.msra.mxu0 %v696_v20 }
  0x36   :  { %635 = vmatprep.subr.bf16.mxu0 %v697_v21 }
  0x39   :  { %636 = vmatpush3.bf16.msra.mxu0 %v697_v21 }
  0x3a   :  { %637 = vmatprep.subr.bf16.mxu0 %v698_v22 }
  0x3b   :  { %606 = vmatmul.mubr.bf16.gmra.mrb[4].mxu0 %v687_v17 }
  0x3d   :  { %638 = vmatpush3.bf16.msra.mxu0 %v698_v22 }
  0x3e   :  { %639 = vmatprep.subr.bf16.mxu0 %v699_v23 }
  0x41   :  { %640 = vmatpush3.bf16.msra.mxu0 %v699_v23 }
  0x42   :  { %641 = vmatprep.subr.bf16.mxu0 %v700_v24 }
  0x45   :  { %642 = vmatpush3.bf16.msra.mxu0 %v700_v24 }
  0x46   :  { %643 = vmatprep.subr.bf16.mxu0 %v701_v25 }
  0x49   :  { %644 = vmatpush3.bf16.msra.mxu0 %v701_v25 }
  0x4a   :  { %645 = vmatprep.subr.bf16.mxu0 %v702_v55 }
  0x4d   :  { %646 = vmatpush3.bf16.msra.mxu0 %v702_v55 }
  0x4e   :  { %647 = vmatprep.subr.bf16.mxu0 %v703_v56 }
  0x51   :  { %648 = vmatpush3.bf16.msra.mxu0 %v703_v56 }
 0x106   :  { %v603_v27 = vpop.f32.mrb[0].mxu0 }
 0x107   :  { %v187_v28 = vadd.f32 %v603_v27, %v518_v26  ;;  %v178_v29 = vpop.f32.mrb[1].mxu0 }
 0x108   :  { %v179_v30 = vadd.f32 %v518_v26, %v178_v29  ;;  %v604_v31 = vpop.f32.mrb[2].mxu0 }
 0x109   :  { %v190_v32 = vadd.f32 %v604_v31, %v518_v26  ;;  %v181_v33 = vpop.f32.mrb[3].mxu0  ;;  %v211_v35 = vmax.f32 %v187_v28, 0.0 }
 0x10a   :  { %v182_v34 = vadd.f32 %v518_v26, %v181_v33  ;;  %v209_v37 = vmax.f32 %v179_v30, 0.0 }
 0x10b   :  { %v212_v36 = vmax.f32 %v190_v32, 0.0 }
 0x10c   :  { %v210_v38 = vmax.f32 %v182_v34, 0.0 }
 0x10d   :  { %v218_v39 = vpack.c.bf16 %v212_v36, %v211_v35 }
 0x10e   :  { %v607_v40 = vpop.f32.mrb[4].mxu0  ;;  %v217_v41 = vpack.c.bf16 %v210_v38, %v209_v37 }
 0x10f   :  { %v203_v42 = vadd.f32 %v607_v40, %v518_v26  ;;  %v194_v43 = vpop.f32.mrb[5].mxu0 }
 0x110   :  { %v195_v44 = vadd.f32 %v518_v26, %v194_v43  ;;  %v608_v45 = vpop.f32.mrb[6].mxu0  ;;  %625 = vmatprep.mubr.bf16.mxu1 %v217_v41 }
 0x111   :  { %v206_v46 = vadd.f32 %v608_v45, %v518_v26  ;;  %v197_v47 = vpop.f32.mrb[7].mxu0  ;;  %626 = vmatmul.mubr.bf16.vlgmr.msra.gmra.mrb[0].mxu1 %v218_v39  ;;  %v215_v49 = vmax.f32 %v203_v42, 0.0 }
 0x112   :  { %v198_v48 = vadd.f32 %v518_v26, %v197_v47  ;;  %665 = vmatpush3.bf16.msra.mxu1 %v696_v20  ;;  %v213_v51 = vmax.f32 %v195_v44, 0.0 }
 0x113   :  { %v216_v50 = vmax.f32 %v206_v46, 0.0  ;;  %658 = vmatprep.subr.bf16.mxu1 %v697_v21 }
 0x114   :  { %v214_v52 = vmax.f32 %v198_v48, 0.0 }
 0x115   :  { %v220_v53 = vpack.c.bf16 %v216_v50, %v215_v49 }
 0x116   :  { %v219_v54 = vpack.c.bf16 %v214_v52, %v213_v51  ;;  %666 = vmatpush3.bf16.msra.mxu1 %v697_v21 }
 0x117   :  { %659 = vmatprep.subr.bf16.mxu1 %v698_v22 }
 0x118   :  { %629 = vmatprep.mubr.bf16.mxu1 %v219_v54 }
 0x119   :  { %630 = vmatmul.mubr.bf16.gmra.mrb[4].mxu1 %v220_v53 }
 0x11a   :  { %667 = vmatpush3.bf16.msra.mxu1 %v698_v22  ;;  %v540_v22 = vld [vmem:[%s882_s6] ss:$0 sm:$0xff] }
 0x11b   :  { %660 = vmatprep.subr.bf16.mxu1 %v699_v23 }
 0x11e   :  { %668 = vmatpush3.bf16.msra.mxu1 %v699_v23 }
 0x11f   :  { %661 = vmatprep.subr.bf16.mxu1 %v700_v24 }
 0x122   :  { %669 = vmatpush3.bf16.msra.mxu1 %v700_v24 }
 0x123   :  { %662 = vmatprep.subr.bf16.mxu1 %v701_v25 }
 0x126   :  { %670 = vmatpush3.bf16.msra.mxu1 %v701_v25 }
 0x127   :  { %663 = vmatprep.subr.bf16.mxu1 %v702_v55 }
 0x12a   :  { %671 = vmatpush3.bf16.msra.mxu1 %v702_v55 }
 0x12b   :  { %664 = vmatprep.subr.bf16.mxu1 %v703_v56 }
 0x12e   :  { %672 = vmatpush3.bf16.msra.mxu1 %v703_v56 }
 0x1e4   :  { %v627_v58 = vpop.f32.mrb[0].mxu1 }
 0x1e5   :  { %v335_v59 = vadd.f32 %v627_v58, %v531_v57  ;;  %v326_v60 = vpop.f32.mrb[1].mxu1 }
 0x1e6   :  { %v327_v61 = vadd.f32 %v531_v57, %v326_v60  ;;  %v628_v62 = vpop.f32.mrb[2].mxu1 }
 0x1e7   :  { %v338_v63 = vadd.f32 %v628_v62, %v531_v57  ;;  %v329_v0 = vpop.f32.mrb[3].mxu1  ;;  %v359_v2 = vmax.f32 %v335_v59, 0.0 }
 0x1e8   :  { %v330_v1 = vadd.f32 %v531_v57, %v329_v0  ;;  %v357_v4 = vmax.f32 %v327_v61, 0.0 }
 0x1e9   :  { %v360_v3 = vmax.f32 %v338_v63, 0.0 }
 0x1ea   :  { %v358_v5 = vmax.f32 %v330_v1, 0.0 }
 0x1eb   :  { %v366_v6 = vpack.c.bf16 %v360_v3, %v359_v2 }
 0x1ec   :  { %v365_v7 = vpack.c.bf16 %v358_v5, %v357_v4  ;;  %v631_v8 = vpop.f32.mrb[4].mxu1 }
 0x1ed   :  { %v351_v9 = vadd.f32 %v631_v8, %v531_v57  ;;  %v342_v10 = vpop.f32.mrb[5].mxu1 }
 0x1ee   :  { %v343_v11 = vadd.f32 %v531_v57, %v342_v10  ;;  %v632_v12 = vpop.f32.mrb[6].mxu1  ;;  %649 = vmatprep.mubr.bf16.mxu0 %v365_v7 }
 0x1ef   :  { %v354_v13 = vadd.f32 %v632_v12, %v531_v57  ;;  %v345_v14 = vpop.f32.mrb[7].mxu1  ;;  %650 = vmatmul.mubr.bf16.vlgmr.msra.gmra.mrb[8].mxu0 %v366_v6  ;;  %v363_v16 = vmax.f32 %v351_v9, 0.0 }
 0x1f0   :  { %v346_v15 = vadd.f32 %v531_v57, %v345_v14  ;;  %v361_v18 = vmax.f32 %v343_v11, 0.0 }
 0x1f1   :  { %v364_v17 = vmax.f32 %v354_v13, 0.0 }
 0x1f2   :  { %v362_v19 = vmax.f32 %v346_v15, 0.0 }
 0x1f3   :  { %v368_v20 = vpack.c.bf16 %v364_v17, %v363_v16 }
 0x1f4   :  { %v367_v21 = vpack.c.bf16 %v362_v19, %v361_v18 }
 0x1f6   :  { %653 = vmatprep.mubr.bf16.mxu1 %v367_v21 }
 0x1f7   :  { %654 = vmatmul.mubr.bf16.vlgmr.msra.gmra.mrb[8].mxu1 %v368_v20 }
 0x2c2   :  { %v651_v23 = vpop.f32.mrb[8].mxu0 }
 0x2c3   :  { %v483_v24 = vadd.f32 %v651_v23, %v540_v22  ;;  %v474_v25 = vpop.f32.mrb[9].mxu0 }
 0x2c4   :  { %v475_v26 = vadd.f32 %v540_v22, %v474_v25  ;;  %v652_v27 = vpop.f32.mrb[10].mxu0 }
 0x2c5   :  { %507 = vst [vmem:[%s883_s7 + $0x10] sm:$0xff] %v483_v24  ;;  %v486_v28 = vadd.f32 %v652_v27, %v540_v22  ;;  %v477_v29 = vpop.f32.mrb[11].mxu0 }
 0x2c6   :  { %505 = vst [vmem:[%s883_s7] sm:$0xff] %v475_v26  ;;  %v478_v30 = vadd.f32 %v540_v22, %v477_v29 }
 0x2c7   :  { %508 = vst [vmem:[%s883_s7 + $0x18] sm:$0xff] %v486_v28 }
 0x2c8   :  { %506 = vst [vmem:[%s883_s7 + $0x8] sm:$0xff] %v478_v30 }
 0x2ca   :  { %v655_v31 = vpop.f32.mrb[8].mxu1 }
 0x2cb   :  { %v499_v32 = vadd.f32 %v655_v31, %v540_v22  ;;  %v490_v33 = vpop.f32.mrb[9].mxu1 }
 0x2cc   :  { %v491_v34 = vadd.f32 %v540_v22, %v490_v33  ;;  %v656_v35 = vpop.f32.mrb[10].mxu1 }
 0x2cd   :  { %511 = vst [vmem:[%s883_s7 + $0x30] sm:$0xff] %v499_v32  ;;  %v502_v36 = vadd.f32 %v656_v35, %v540_v22  ;;  %v493_v37 = vpop.f32.mrb[11].mxu1 }
 0x2ce   :  { %509 = vst [vmem:[%s883_s7 + $0x20] sm:$0xff] %v491_v34  ;;  %v494_v38 = vadd.f32 %v540_v22, %v493_v37 }
 0x2cf   :  { %512 = vst [vmem:[%s883_s7 + $0x38] sm:$0xff] %v502_v36 }
 0x2d0   :  { %510 = vst [vmem:[%s883_s7 + $0x28] sm:$0xff] %v494_v38 }
 0x2d1   :  { %517 = vsyncpa [#allocation3], 1 }

</bundles_post_ra>
